<compile_context>
chip_gen: v7x
topology: tpu7x:2x2x1
jax: 0.10.0
libtpu: 0.0.40
codegen_flags: <defaults>
</compile_context>

<pallas_src>
import jax
import jax.numpy as jnp
from jax.experimental import pallas as pl
from jax.experimental.pallas import tpu as pltpu


_LANES = 1024              # lane-dense width: multiple of 128 -> unmasked stores
_DEFAULT_TILE_ROWS = 512   # 512 x 1024 f32 = 2 MiB/tile; ~8 MiB double-buffered


def _affine_kernel(w_ref, b_ref, x_ref, o_ref):
    # w_ref: (1, 1) in SMEM, b_ref: (1,) in SMEM,
    # x_ref / o_ref: (tile_rows, _LANES) tiles in VMEM.  Pure VPU multiply-add;
    # the scalar broadcasts are hoisted once per grid step by the compiler.
    o_ref[...] = x_ref[...] * w_ref[0, 0] + b_ref[0]


def _round_up(a, b):
    return ((a + b - 1) // b) * b


def _pallas_affine(x_flat, weight, bias, tile_rows):
    """x_flat: (N,) f32.  Returns (N,) f32 = x*w + b via a tiled Pallas kernel."""
    n = x_flat.shape[0]
    rows = pl.cdiv(n, _LANES)
    # Sublane-aligned tile height; shrink for small inputs so we never DMA a
    # mostly-padding tile.
    if rows >= tile_rows:
        tr = tile_rows
    else:
        tr = max(8, _round_up(rows, 8))
    padded_rows = _round_up(rows, tr)
    padded_len = padded_rows * _LANES

    # Zero-pad the tail so the (rows, 1024) relayout / tiling never reads or
    # writes outside the logical range; sliced back off below.  When N is
    # already a multiple of the tile size the pad is a no-op.
    x_pad = jnp.pad(x_flat, (0, padded_len - n)).reshape(padded_rows, _LANES)

    grid = (padded_rows // tr,)
    out = pl.pallas_call(
        _affine_kernel,
        out_shape=jax.ShapeDtypeStruct((padded_rows, _LANES), x_flat.dtype),
        grid=grid,
        in_specs=[
            pl.BlockSpec(memory_space=pltpu.MemorySpace.SMEM),   # weight (1,1)
            pl.BlockSpec(memory_space=pltpu.MemorySpace.SMEM),   # bias (1,)
            pl.BlockSpec((tr, _LANES), lambda i: (i, 0)),        # x tiles
        ],
        out_specs=pl.BlockSpec((tr, _LANES), lambda i: (i, 0)),
        compiler_params=pltpu.CompilerParams(
            dimension_semantics=("parallel",),       # megacore sharding on v7x
            vmem_limit_bytes=32 * 1024 * 1024,       # explicit, generation-safe
        ),
    )(weight, bias, x_pad)
    return out.reshape(-1)[:n]


def regressor_forward(x, weight, bias, *,
                      min_pallas_elems=65536,
                      tile_rows=_DEFAULT_TILE_ROWS,
                      force_pallas=False):
    """x: (N, 1) f32, weight: (1, 1) f32, bias: (1,) f32 -> (N, 1) f32."""
    n, in_f = x.shape
    assert in_f == 1 and weight.shape == (1, 1) and bias.shape == (1,)
    if not force_pallas and n < min_pallas_elems:
        # Tiny inputs: pallas_call launch/step overhead dwarfs a handful of
        # multiply-adds; let XLA fuse the affine op.
        return x * weight[0, 0] + bias[0]
    y = _pallas_affine(x.reshape(-1), weight, bias, tile_rows)
    return y.reshape(n, 1)


if __name__ == "__main__":
    key = jax.random.PRNGKey(0)
    k_x, k_w, k_b = jax.random.split(key, 3)

    # Deterministic parameter init (mimicking nn.Linear's U(-1, 1) bound for
    # in_features=1), not a checkpoint load.
    weight = jax.random.uniform(k_w, (1, 1), minval=-1.0, maxval=1.0,
                                dtype=jnp.float32)
    bias = jax.random.uniform(k_b, (1,), minval=-1.0, maxval=1.0,
                              dtype=jnp.float32)

    # Small batch consistent with Linear(1, 1): 8 scalar samples.
    x_small = jax.random.normal(k_x, (8, 1), dtype=jnp.float32)
    ref_small = x_small @ weight.T + bias

    # 1) Default dispatch for a tiny batch: XLA-fused fallback.
    out_fb = jax.block_until_ready(regressor_forward(x_small, weight, bias))
    assert out_fb.shape == (8, 1)
    assert jnp.allclose(out_fb, ref_small, atol=1e-6, rtol=1e-6)

    # 2) Run the Pallas kernel on the same small shape (forced), exercising
    #    the lane-dense pad/reshape path with a single tile.
    out_kn = jax.block_until_ready(
        regressor_forward(x_small, weight, bias, force_pallas=True))
    assert out_kn.shape == (8, 1)
    assert jnp.allclose(out_kn, ref_small, atol=1e-6, rtol=1e-6)

    # 3) Exercise the multi-tile grid + tail-padding path cheaply:
    #    N = 12345 (not a multiple of 1024), small tile_rows so grid > 1.
    x_mid = jax.random.normal(k_x, (12345, 1), dtype=jnp.float32)
    ref_mid = x_mid @ weight.T + bias
    out_mid = jax.block_until_ready(
        regressor_forward(x_mid, weight, bias, force_pallas=True, tile_rows=8))
    assert out_mid.shape == (12345, 1)
    assert jnp.allclose(out_mid, ref_mid, atol=1e-6, rtol=1e-6)

    print("KERNEL_OK")
</pallas_src>

<mosaic_0001>
module attributes {stable_mosaic.version = 11 : i64} {
  func.func @_affine_kernel(%arg0: i32, %arg1: memref<1x1xf32, #tpu.memory_space<smem>>, %arg2: memref<1xf32, #tpu.memory_space<smem>>, %arg3: memref<8x1024xf32, #tpu.memory_space<vmem>>, %arg4: memref<8x1024xf32, #tpu.memory_space<vmem>>) attributes {dimension_semantics = [#tpu.dimension_semantics<parallel>], iteration_bounds = array<i64: 1>, scalar_prefetch = 0 : i64, scratch_operands = 0 : i64, tpu.core_type = #tpu.core_type<tc>, window_params = [{transform_indices = @transform_0, window_bounds = array<i64: 1, 1>}, {transform_indices = @transform_1, window_bounds = array<i64: 1>}, {transform_indices = @transform_2, window_bounds = array<i64: 8, 1024>}, {transform_indices = @transform_3, window_bounds = array<i64: 8, 1024>}]} {
    %c0 = arith.constant 0 : index
    %c0_0 = arith.constant 0 : index
    %0 = vector.load %arg3[%c0, %c0_0] : memref<8x1024xf32, #tpu.memory_space<vmem>>, vector<8x1024xf32>
    %c0_1 = arith.constant 0 : index
    %c0_2 = arith.constant 0 : index
    %1 = memref.load %arg1[%c0_1, %c0_2] : memref<1x1xf32, #tpu.memory_space<smem>>
    %2 = vector.broadcast %1 : f32 to vector<8x1024xf32>
    %3 = arith.mulf %0, %2 : vector<8x1024xf32>
    %c0_3 = arith.constant 0 : index
    %4 = memref.load %arg2[%c0_3] : memref<1xf32, #tpu.memory_space<smem>>
    %5 = vector.broadcast %4 : f32 to vector<8x1024xf32>
    %6 = arith.addf %3, %5 : vector<8x1024xf32>
    %c0_4 = arith.constant 0 : index
    %c0_5 = arith.constant 0 : index
    %7 = vector.load %arg4[%c0_4, %c0_5] : memref<8x1024xf32, #tpu.memory_space<vmem>>, vector<8x1024xf32>
    tpu.vector_store %arg4[%c0_4, %c0_5], %6 {strides = array<i32>} : memref<8x1024xf32, #tpu.memory_space<vmem>>, vector<8x1024xf32>,
    return
  }
  func.func @transform_0(%arg0: i32) -> (i32, i32) {
    %c0_i32 = arith.constant 0 : i32
    %c0_i32_0 = arith.constant 0 : i32
    %c0_i32_1 = arith.constant 0 : i32
    return %c0_i32, %c0_i32_0 : i32, i32
  }
  func.func @transform_1(%arg0: i32) -> i32 {
    %c0_i32 = arith.constant 0 : i32
    %c0_i32_0 = arith.constant 0 : i32
    return %c0_i32 : i32
  }
  func.func @transform_2(%arg0: i32) -> (i32, i32) {
    %c0_i32 = arith.constant 0 : i32
    %c0_i32_0 = arith.constant 0 : i32
    return %arg0, %c0_i32 : i32, i32
  }
  func.func @transform_3(%arg0: i32) -> (i32, i32) {
    %c0_i32 = arith.constant 0 : i32
    %c0_i32_0 = arith.constant 0 : i32
    return %arg0, %c0_i32 : i32, i32
  }
}

</mosaic_0001>

<bundles_post_ra>
// kernel: tpu_custom_call.1
= control target key start
LH: loop header
LB: loop body
LE: loop exit
PB: predicated region body
PF: predicated region fallthrough
CT: control target
= control target key end

     0   :  { %10 = vsyncpa [#allocation5], 0  ;;  %s182_s0 = inlined_call_operand.<no memory space> [shape: f32[1,1], index: 0, kind: input, shape index: {}]   ;;  %s183_s1 = inlined_call_operand.<no memory space> [shape: f32[1], index: 1, kind: input, shape index: {}]   ;;  %s184_s2 = inlined_call_operand.hbm [shape: f32[8,1024], index: 2, kind: input, shape index: {}]   ;;  %s185_s3 = inlined_call_operand.hbm [shape: f32[8,1024], index: 3, kind: output, shape index: {}]  }
   0x1   :  { %11 = vsyncpa [#allocation6], 0  ;;  %s130_s12 = smov [#allocation4]   ;;  %s82_s16 = scalar_lea.hbm %s184_s2, 1024 }
   0x2   :  { %s22_s13 = sshll.u32 %s130_s12, 4  ;;  %p83_p0 = scmp.ne.s32.totalorder %s184_s2, %s82_s16  ;;  %s23_s13 = int_to_ptr.vmem [resolvable:$true] %s22_s13 }
   0x3   :  { %p86_p1 = scmp.lt.u32.totalorder %s82_s16, %s184_s2 }
   0x5   :  { %p88_p2 = pnand %p86_p1, %p83_p0 }
   0x7   :  { %91 = shalt.err (!%p88_p2)
}
   0x8   :  { %s92_s21 = scalar_lea.vmem %s23_s13, 1024  ;;  %p97_p4 = scmp.lt.s32.totalorder %s23_s13, %s23_s13 }
   0x9   :  { %p93_p3 = scmp.ne.s32.totalorder %s23_s13, %s92_s21  ;;  %p98_p5 = scmp.lt.s32.totalorder %s92_s21, %s92_s21 }
   0xb   :  { %p99_p6 = por %p98_p5, %p97_p4 }
   0xd   :  { %p100_p7 = pnand %p99_p6, %p93_p3 }
   0xf   :  { %103 = shalt.err (!%p100_p7)
}
  0x10   :  { %25 = dma.hbm_to_vmem [thread:$0]  %s184_s2, 1024, %s23_s13, [#allocation5]  }
  0x11   :  { %126 = dma.done.wait [#allocation5], 1024  }
  0x12   :  { %127 = vsyncadd [#allocation5], 4294966272  ;;  %v38_v0 = vstv %s182_s0  ;;  %v29_v1 = vld [vmem:[#allocation4] sm:$0xff]  ;;  %v48_v2 = vstv %s183_s1  ;;  %v30_v3 = vld [vmem:[#allocation4 + $0x8] sm:$0xff]  ;;  %s131_s0 = smov [#allocation7]  }
  0x13   :  { %v31_v4 = vld [vmem:[#allocation4 + $0x10] sm:$0xff]  ;;  %v39_v5 = vmul.f32 %v38_v0, %v29_v1  ;;  %v40_v6 = vmul.f32 %v38_v0, %v30_v3  ;;  %v32_v8 = vld [vmem:[#allocation4 + $0x18] sm:$0xff]  ;;  %v33_v9 = vld [vmem:[#allocation4 + $0x20] sm:$0xff]  ;;  %s71_s2 = sshll.u32 %s131_s0, 4  ;;  %s72_s2 = int_to_ptr.vmem [resolvable:$true] %s71_s2 }
  0x14   :  { %v41_v7 = vmul.f32 %v38_v0, %v31_v4  ;;  %v34_v10 = vld [vmem:[#allocation4 + $0x28] sm:$0xff]  ;;  %v42_v11 = vmul.f32 %v38_v0, %v32_v8  ;;  %v43_v12 = vmul.f32 %v38_v0, %v33_v9  ;;  %v35_v14 = vld [vmem:[#allocation4 + $0x30] sm:$0xff]  ;;  %v36_v15 = vld [vmem:[#allocation4 + $0x38] sm:$0xff]  ;;  %s104_s1 = scalar_lea.vmem %s72_s2, 1024  ;;  %p109_p9 = scmp.lt.s32.totalorder %s72_s2, %s72_s2 }
  0x15   :  { %v44_v13 = vmul.f32 %v38_v0, %v34_v10  ;;  %v49_v16 = vadd.f32 %v48_v2, %v39_v5  ;;  %v50_v17 = vadd.f32 %v48_v2, %v40_v6  ;;  %v45_v19 = vmul.f32 %v38_v0, %v35_v14  ;;  %p105_p8 = scmp.ne.s32.totalorder %s72_s2, %s104_s1  ;;  %p110_p10 = scmp.lt.s32.totalorder %s104_s1, %s104_s1 }
  0x16   :  { %v51_v18 = vadd.f32 %v48_v2, %v41_v7  ;;  %v52_v20 = vadd.f32 %v48_v2, %v42_v11  ;;  %v53_v21 = vadd.f32 %v48_v2, %v43_v12  ;;  %v46_v23 = vmul.f32 %v38_v0, %v36_v15 }
  0x17   :  { %v54_v22 = vadd.f32 %v48_v2, %v44_v13  ;;  %57 = vst [vmem:[#allocation7] sm:$0xff] %v49_v16  ;;  %58 = vst [vmem:[#allocation7 + $0x8] sm:$0xff] %v50_v17  ;;  %v55_v24 = vadd.f32 %v48_v2, %v45_v19  ;;  %p111_p11 = por %p110_p10, %p109_p9 }
  0x18   :  { %59 = vst [vmem:[#allocation7 + $0x10] sm:$0xff] %v51_v18  ;;  %60 = vst [vmem:[#allocation7 + $0x18] sm:$0xff] %v52_v20  ;;  %v56_v25 = vadd.f32 %v48_v2, %v46_v23 }
  0x19   :  { %61 = vst [vmem:[#allocation7 + $0x20] sm:$0xff] %v53_v21  ;;  %62 = vst [vmem:[#allocation7 + $0x28] sm:$0xff] %v54_v22  ;;  %p112_p12 = pnand %p111_p11, %p105_p8 }
  0x1a   :  { %63 = vst [vmem:[#allocation7 + $0x30] sm:$0xff] %v55_v24  ;;  %64 = vst [vmem:[#allocation7 + $0x38] sm:$0xff] %v56_v25 }
  0x1b   :  { %115 = shalt.err (!%p112_p12)
}
  0x1c   :  { %s116_s30 = scalar_lea.hbm %s185_s3, 1024 }
  0x1d   :  { %p117_p13 = scmp.ne.s32.totalorder %s185_s3, %s116_s30  ;;  %p120_p0 = scmp.lt.u32.totalorder %s116_s30, %s185_s3 }
  0x1f   :  { %p122_p1 = pnand %p120_p0, %p117_p13 }
  0x21   :  { %125 = shalt.err (!%p122_p1)
}
  0x22   :  { %74 = dma.vmem_to_hbm [thread:$0]  %s72_s2, 1024, %s185_s3, [#allocation6]  }
  0x23   :  { %128 = dma.done.wait [#allocation6], 1024  }
  0x24   :  { %129 = vsyncadd [#allocation6], 4294966272 }
  0x25   :  { %78 = vsyncpa [#allocation5], 1 }
  0x26   :  { %79 = vsyncpa [#allocation6], 1 }

</bundles_post_ra>
